<compile_context>
chip_gen: v6e
topology: v6e:2x2x1
jax: 0.10.0
libtpu: 0.0.40
codegen_flags: <defaults>
</compile_context>

<pallas_src>
import math

import jax
import jax.numpy as jnp
import numpy as np
from jax.experimental import pallas as pl
from jax.experimental.pallas import tpu as pltpu

_LANE = 128


def _make_kernel(sub_tiles, tl0, k):
    """Kernel closure over the static tiling constants."""

    def kernel(x_ref, w_ref, s_ref, b_ref, o_ref):
        # x_ref: (C_in, TL)        input slice in native NCL layout
        # w_ref: (K, C_out, C_in)  resident, w_ref[j, o, i] = W[i, o, j]
        # s_ref: (K, TL0, TL0*K)   resident 0/1 spread matrices
        # b_ref: (C_out, TL0*K)    resident, bias tiled along the L axis
        # o_ref: (C_out, TL*K)     lane-dense output block, PyTorch layout
        bias = b_ref[...]                      # f32, reused for every sub-tile
        for sub in range(sub_tiles):           # static unroll (<= 8)
            xs = x_ref[:, sub * tl0:(sub + 1) * tl0].astype(jnp.float32)
            acc = bias
            for j in range(k):                 # static unroll (K is small)
                # channel mixing: (C_out, C_in) @ (C_in, TL0) -> (C_out, TL0)
                yj = jnp.dot(w_ref[j], xs, preferred_element_type=jnp.float32)
                # lane interleave l*K+j via spread matmul on the idle MXU:
                # (C_out, TL0) @ (TL0, TL0*K) -> (C_out, TL0*K)
                acc = acc + jnp.dot(yj, s_ref[j],
                                    preferred_element_type=jnp.float32)
            o_ref[:, sub * tl0 * k:(sub + 1) * tl0 * k] = acc.astype(o_ref.dtype)

    return kernel


def learned_upsampling_1d(x, weight, bias=None):
    """x: (B, C_in, L)  weight: (C_in, C_out, K)  bias: (C_out, K) -> (B, C_out, L*K)."""
    B, C_in, L = x.shape
    _, C_out, K = weight.shape
    if bias is None:
        bias = jnp.zeros((C_out, K), dtype=jnp.float32)
    itemsize = jnp.dtype(x.dtype).itemsize

    # --- tiling choice -------------------------------------------------------
    if L <= _LANE:
        tl0, sub_tiles = L, 1                 # full (small) length, no padding
    else:
        tl0 = _LANE                           # keep spread matmul at 128 lanes
        step_bytes = C_out * tl0 * K * itemsize
        # enough 128-wide sub-tiles per grid step for a >~0.5 MB output DMA
        sub_tiles = max(1, min(8, pl.cdiv(512 * 1024, step_bytes)))
        sub_tiles = min(sub_tiles, pl.cdiv(L, tl0))
    TL = tl0 * sub_tiles
    n_lt = pl.cdiv(L, TL)
    L_pad = n_lt * TL
    if L_pad != L:
        x = jnp.pad(x, ((0, 0), (0, 0), (0, L_pad - L)))

    # --- small resident operands (all f32 on the accumulation path) ----------
    w_t = jnp.transpose(weight, (2, 1, 0)).astype(jnp.float32)        # (K, C_out, C_in)
    l_idx = jnp.arange(tl0)
    m_idx = jnp.arange(tl0 * K)
    j_idx = jnp.arange(K)
    spread = (m_idx[None, None, :] ==
              (l_idx[None, :, None] * K + j_idx[:, None, None])
              ).astype(jnp.float32)                                   # (K, TL0, TL0*K)
    bias_t = jnp.tile(bias.astype(jnp.float32), (1, tl0))             # (C_out, TL0*K)

    # --- VMEM budget / cost hints --------------------------------------------
    blk_bytes = 2 * (C_in * TL + C_out * TL * K) * 4                  # dbl-buffered blocks
    res_bytes = 2 * 4 * (w_t.size + spread.size + bias_t.size)        # resident operands
    vmem_limit = int(min(max(blk_bytes + res_bytes + (2 << 20), 8 << 20), 40 << 20))
    flops = int(2 * B * L_pad * C_out * K * (C_in + tl0 * K))
    bytes_accessed = int(x.size * itemsize
                         + 4 * (w_t.size + spread.size + bias_t.size)
                         + B * C_out * L_pad * K * itemsize)

    out_pad = pl.pallas_call(
        _make_kernel(sub_tiles, tl0, K),
        out_shape=jax.ShapeDtypeStruct((B, C_out, L_pad * K), x.dtype),
        grid=(B, n_lt),
        in_specs=[
            pl.BlockSpec((None, C_in, TL), lambda b, lt: (b, 0, lt)),      # x (native NCL)
            pl.BlockSpec((K, C_out, C_in), lambda b, lt: (0, 0, 0)),       # W (resident)
            pl.BlockSpec((K, tl0, tl0 * K), lambda b, lt: (0, 0, 0)),      # spread (resident)
            pl.BlockSpec((C_out, tl0 * K), lambda b, lt: (0, 0)),          # bias (resident)
        ],
        out_specs=pl.BlockSpec((None, C_out, TL * K), lambda b, lt: (b, 0, lt)),
        compiler_params=pltpu.CompilerParams(
            dimension_semantics=("parallel", "parallel"),
            vmem_limit_bytes=vmem_limit,
        ),
        cost_estimate=pl.CostEstimate(
            flops=flops, transcendentals=0, bytes_accessed=bytes_accessed),
    )(x, w_t, spread, bias_t)

    if L_pad != L:
        out_pad = out_pad[:, :, : L * K]
    return out_pad


def init_params(key, in_channels, out_channels, kernel_size):
    """Deterministic parameter init (mirrors PyTorch shapes; synthetic values)."""
    kw, kb = jax.random.split(key)
    fan_in = out_channels * kernel_size
    bound = 1.0 / math.sqrt(fan_in)
    weight = jax.random.uniform(
        kw, (in_channels, out_channels, kernel_size),
        minval=-bound, maxval=bound, dtype=jnp.float32)
    # The module resets bias to 0; use small random values so the bias path is
    # actually exercised (deterministic, synthetic).
    bias = 0.1 * jax.random.normal(kb, (out_channels, kernel_size), dtype=jnp.float32)
    return weight, bias


def reference(x, weight, bias):
    # y[b, o, l*K + j] = sum_i x[b, i, l] * W[i, o, j] + bias[o, j]
    B, C_in, L = x.shape
    _, C_out, K = weight.shape
    y = jnp.einsum("bil,ioj->bolj", x, weight) + bias[None, :, None, :]
    return y.reshape(B, C_out, L * K)


def _check(B, C_in, L, C_out, K, key):
    kx, kp = jax.random.split(key)
    x = jax.random.normal(kx, (B, C_in, L), dtype=jnp.float32)
    weight, bias = init_params(kp, C_in, C_out, K)
    out = jax.block_until_ready(learned_upsampling_1d(x, weight, bias))
    ref = reference(x, weight, bias)
    assert out.shape == (B, C_out, L * K), out.shape
    np.testing.assert_allclose(np.asarray(out), np.asarray(ref), rtol=1e-5, atol=1e-5)


if __name__ == "__main__":
    key = jax.random.PRNGKey(0)
    k1, k2 = jax.random.split(key)

    # Small shape consistent with the module (single-tile path).
    _check(B=2, C_in=4, L=16, C_out=6, K=3, key=k1)
    # Longer length to exercise the tiled / padded multi-sub-tile path.
    _check(B=2, C_in=4, L=320, C_out=6, K=3, key=k2)

    print("KERNEL_OK")
</pallas_src>

<mosaic_0001>
module attributes {stable_mosaic.version = 11 : i64} {
  func.func @kernel(%arg0: i32, %arg1: i32, %arg2: memref<1x4x16xf32, #tpu.memory_space<vmem>>, %arg3: memref<3x6x4xf32, #tpu.memory_space<vmem>>, %arg4: memref<3x16x48xf32, #tpu.memory_space<vmem>>, %arg5: memref<6x48xf32, #tpu.memory_space<vmem>>, %arg6: memref<1x6x48xf32, #tpu.memory_space<vmem>>) attributes {dimension_semantics = [#tpu.dimension_semantics<parallel>, #tpu.dimension_semantics<parallel>], iteration_bounds = array<i64: 2, 1>, scalar_prefetch = 0 : i64, scratch_operands = 0 : i64, tpu.core_type = #tpu.core_type<tc>, window_params = [{transform_indices = @transform_0, window_bounds = array<i64: 1, 4, 16>}, {pipeline_mode = #tpu.pipeline_mode<synchronous>, transform_indices = @transform_1, window_bounds = array<i64: 3, 6, 4>}, {pipeline_mode = #tpu.pipeline_mode<synchronous>, transform_indices = @transform_2, window_bounds = array<i64: 3, 16, 48>}, {pipeline_mode = #tpu.pipeline_mode<synchronous>, transform_indices = @transform_3, window_bounds = array<i64: 6, 48>}, {transform_indices = @transform_4, window_bounds = array<i64: 1, 6, 48>}]} {
    %c0 = arith.constant 0 : index
    %c0_0 = arith.constant 0 : index
    %0 = vector.load %arg5[%c0, %c0_0] : memref<6x48xf32, #tpu.memory_space<vmem>>, vector<6x48xf32>
    %c0_1 = arith.constant 0 : index
    %c0_2 = arith.constant 0 : index
    %c0_3 = arith.constant 0 : index
    %1 = vector.load %arg2[%c0_1, %c0_2, %c0_3] : memref<1x4x16xf32, #tpu.memory_space<vmem>>, vector<1x4x16xf32>
    %2 = vector.shape_cast %1 : vector<1x4x16xf32> to vector<4x16xf32>
    %c0_4 = arith.constant 0 : index
    %c0_5 = arith.constant 0 : index
    %c0_6 = arith.constant 0 : index
    %3 = vector.load %arg3[%c0_4, %c0_5, %c0_6] : memref<3x6x4xf32, #tpu.memory_space<vmem>>, vector<1x6x4xf32>
    %4 = vector.shape_cast %3 : vector<1x6x4xf32> to vector<6x4xf32>
    %cst = arith.constant dense<0.000000e+00> : vector<6x16xf32>
    %5 = tpu.matmul %4, %2, %cst {dimension_numbers = #tpu.dot_dimension_numbers<[1], [0], [0], [1], [0, 0, 1, 1], [], []>} : vector<6x4xf32>, vector<4x16xf32>, vector<6x16xf32> -> vector<6x16xf32>
    %c0_7 = arith.constant 0 : index
    %c0_8 = arith.constant 0 : index
    %c0_9 = arith.constant 0 : index
    %6 = vector.load %arg4[%c0_7, %c0_8, %c0_9] : memref<3x16x48xf32, #tpu.memory_space<vmem>>, vector<1x16x48xf32>
    %7 = vector.shape_cast %6 : vector<1x16x48xf32> to vector<16x48xf32>
    %cst_10 = arith.constant dense<0.000000e+00> : vector<6x48xf32>
    %8 = tpu.matmul %5, %7, %cst_10 {dimension_numbers = #tpu.dot_dimension_numbers<[1], [0], [0], [1], [0, 0, 1, 1], [], []>} : vector<6x16xf32>, vector<16x48xf32>, vector<6x48xf32> -> vector<6x48xf32>
    %9 = arith.addf %0, %8 : vector<6x48xf32>
    %c1 = arith.constant 1 : index
    %c0_11 = arith.constant 0 : index
    %c0_12 = arith.constant 0 : index
    %10 = vector.load %arg3[%c1, %c0_11, %c0_12] : memref<3x6x4xf32, #tpu.memory_space<vmem>>, vector<1x6x4xf32>
    %11 = vector.shape_cast %10 : vector<1x6x4xf32> to vector<6x4xf32>
    %cst_13 = arith.constant dense<0.000000e+00> : vector<6x16xf32>
    %12 = tpu.matmul %11, %2, %cst_13 {dimension_numbers = #tpu.dot_dimension_numbers<[1], [0], [0], [1], [0, 0, 1, 1], [], []>} : vector<6x4xf32>, vector<4x16xf32>, vector<6x16xf32> -> vector<6x16xf32>
    %c1_14 = arith.constant 1 : index
    %c0_15 = arith.constant 0 : index
    %c0_16 = arith.constant 0 : index
    %13 = vector.load %arg4[%c1_14, %c0_15, %c0_16] : memref<3x16x48xf32, #tpu.memory_space<vmem>>, vector<1x16x48xf32>
    %14 = vector.shape_cast %13 : vector<1x16x48xf32> to vector<16x48xf32>
    %cst_17 = arith.constant dense<0.000000e+00> : vector<6x48xf32>
    %15 = tpu.matmul %12, %14, %cst_17 {dimension_numbers = #tpu.dot_dimension_numbers<[1], [0], [0], [1], [0, 0, 1, 1], [], []>} : vector<6x16xf32>, vector<16x48xf32>, vector<6x48xf32> -> vector<6x48xf32>
    %16 = arith.addf %9, %15 : vector<6x48xf32>
    %c2 = arith.constant 2 : index
    %c0_18 = arith.constant 0 : index
    %c0_19 = arith.constant 0 : index
    %17 = vector.load %arg3[%c2, %c0_18, %c0_19] : memref<3x6x4xf32, #tpu.memory_space<vmem>>, vector<1x6x4xf32>
    %18 = vector.shape_cast %17 : vector<1x6x4xf32> to vector<6x4xf32>
    %cst_20 = arith.constant dense<0.000000e+00> : vector<6x16xf32>
    %19 = tpu.matmul %18, %2, %cst_20 {dimension_numbers = #tpu.dot_dimension_numbers<[1], [0], [0], [1], [0, 0, 1, 1], [], []>} : vector<6x4xf32>, vector<4x16xf32>, vector<6x16xf32> -> vector<6x16xf32>
    %c2_21 = arith.constant 2 : index
    %c0_22 = arith.constant 0 : index
    %c0_23 = arith.constant 0 : index
    %20 = vector.load %arg4[%c2_21, %c0_22, %c0_23] : memref<3x16x48xf32, #tpu.memory_space<vmem>>, vector<1x16x48xf32>
    %21 = vector.shape_cast %20 : vector<1x16x48xf32> to vector<16x48xf32>
    %cst_24 = arith.constant dense<0.000000e+00> : vector<6x48xf32>
    %22 = tpu.matmul %19, %21, %cst_24 {dimension_numbers = #tpu.dot_dimension_numbers<[1], [0], [0], [1], [0, 0, 1, 1], [], []>} : vector<6x16xf32>, vector<16x48xf32>, vector<6x48xf32> -> vector<6x48xf32>
    %23 = arith.addf %16, %22 : vector<6x48xf32>
    %c0_25 = arith.constant 0 : index
    %c0_26 = arith.constant 0 : index
    %c0_27 = arith.constant 0 : index
    %24 = vector.load %arg6[%c0_25, %c0_26, %c0_27] : memref<1x6x48xf32, #tpu.memory_space<vmem>>, vector<1x6x48xf32>
    %25 = vector.shape_cast %24 : vector<1x6x48xf32> to vector<6x48xf32>
    %26 = vector.shape_cast %23 : vector<6x48xf32> to vector<1x6x48xf32>
    tpu.vector_store %arg6[%c0_25, %c0_26, %c0_27], %26 {strides = array<i32>} : memref<1x6x48xf32, #tpu.memory_space<vmem>>, vector<1x6x48xf32>,
    return
  }
  func.func @transform_0(%arg0: i32, %arg1: i32) -> (i32, i32, i32) {
    %c0_i32 = arith.constant 0 : i32
    %c0_i32_0 = arith.constant 0 : i32
    return %arg0, %c0_i32, %arg1 : i32, i32, i32
  }
  func.func @transform_1(%arg0: i32, %arg1: i32) -> (i32, i32, i32) {
    %c0_i32 = arith.constant 0 : i32
    %c0_i32_0 = arith.constant 0 : i32
    %c0_i32_1 = arith.constant 0 : i32
    %c0_i32_2 = arith.constant 0 : i32
    return %c0_i32, %c0_i32_0, %c0_i32_1 : i32, i32, i32
  }
  func.func @transform_2(%arg0: i32, %arg1: i32) -> (i32, i32, i32) {
    %c0_i32 = arith.constant 0 : i32
    %c0_i32_0 = arith.constant 0 : i32
    %c0_i32_1 = arith.constant 0 : i32
    %c0_i32_2 = arith.constant 0 : i32
    return %c0_i32, %c0_i32_0, %c0_i32_1 : i32, i32, i32
  }
  func.func @transform_3(%arg0: i32, %arg1: i32) -> (i32, i32) {
    %c0_i32 = arith.constant 0 : i32
    %c0_i32_0 = arith.constant 0 : i32
    %c0_i32_1 = arith.constant 0 : i32
    return %c0_i32, %c0_i32_0 : i32, i32
  }
  func.func @transform_4(%arg0: i32, %arg1: i32) -> (i32, i32, i32) {
    %c0_i32 = arith.constant 0 : i32
    %c0_i32_0 = arith.constant 0 : i32
    return %arg0, %c0_i32, %arg1 : i32, i32, i32
  }
}

</mosaic_0001>

<bundles_post_ra>
// kernel: tpu_custom_call.1
= control target key start
LH: loop header
LB: loop body
LE: loop exit
PB: predicated region body
PF: predicated region fallthrough
CT: control target
= control target key end

     0   :  { %9 = vsyncpa [#allocation3], 0  ;;  %s986_s15 = smov 0   ;;  %s988_s16 = smov 0   ;;  %s1073_s0 = inlined_call_operand.vmem [shape: f32[2,4,16], index: 0, kind: input, shape index: {}]   ;;  %s1074_s1 = inlined_call_operand.vmem [shape: f32[3,6,4], index: 1, kind: input, shape index: {}]   ;;  %s1075_s2 = inlined_call_operand.hbm [shape: f32[3,16,48], index: 2, kind: input, shape index: {}]   ;;  %s1076_s3 = inlined_call_operand.vmem [shape: f32[6,48], index: 3, kind: input, shape index: {}]   ;;  %s1077_s4 = inlined_call_operand.vmem [shape: f32[2,6,48], index: 4, kind: output, shape index: {}]  }
   0x1   :  { %s990_s17 = smov 0  }
   0x2 LB: > { %s790_s18 = sadd.s32 4294967295, %s954_s17   ;;  %s27_s19 = sadd.s32 1, %s950_s16  ;;  %s954_s17 = sphi %s990_s17, %s15_s17   ;;  %s950_s16 = sphi %s988_s16, %s1081_s16   ;;  %s946_s15 = sphi %s986_s15, %s1080_s15  }
   0x3   : > { %p29_p0 = scmp.ge.s32.totalorder %s27_s19, 2  ;;  %p792_p1 = scmp.ge.s32.totalorder %s954_s17, 1 }
   0x4   : > { %p151_p2 = scmp.lt.s32.totalorder %s954_s17, 3  ;;  %p1011_p4 = scmp.eq.s32.totalorder %s790_s18, 0 }
   0x5   : > { %s1083_s19 = smov (%p29_p0, %s27_s19), 0  ;;  %s956_s22 = smov [#allocation2]  }
   0x6   : > { %p1007_p3 = pnand %p792_p1, %p151_p2  ;;  %s166_s23 = sshll.u32 %s956_s22, 4  ;;  %s167_s23 = int_to_ptr.vmem [resolvable:$true] %s166_s23 }
   0x7   : > { %s913_s24 = scalar_lea.vmem %s167_s23, 768  ;;  %p921_p11 = scmp.lt.s32.totalorder %s167_s23, %s167_s23 }
   0x8   : > { %p867_p5 = pneg %p1007_p3  ;;  %p914_p8 = scmp.ne.s32.totalorder %s167_s23, %s913_s24 }
   0x9   : > { %p922_p12 = scmp.lt.s32.totalorder %s913_s24, %s913_s24 }
   0xa   : > { %p868_p6 = pnand %p1011_p4, %p867_p5 }
   0xb   : > { %p923_p13 = por %p922_p12, %p921_p11 }
   0xc   : > { %p904_p7 = pneg %p868_p6 }
   0xe   : > { %p916_p9 = pnand %p914_p8, %p904_p7 }
  0x10   : > { %p917_p10 = pneg %p916_p9 }
  0x12   : > { %p924_p0 = pnand %p923_p13, %p917_p10 }
  0x14   : > { %927 = shalt.err (!%p924_p0)
}
  0x15   : > { %s957_s25 = smov 128   ;;  %s958_s26 = smov 8  }
  0x16   : > { %870 = dma.hbm_to_vmem [thread:$0]  (!%p868_p6), %s1075_s2, 768, %s167_s23, [#allocation3], %s957_s25, %s957_s25, %s958_s26  }
  0x17   : > { %195 = sbr.rel (%p1007_p3) target bundleno = 433 (0x1b1), region = 36 }
  0x1c   : > { %941 = dma.done.wait (%p1011_p4), [#allocation3], 768  }
  0x1d   : > { %943 = vsyncadd (%p1011_p4), [#allocation3], 4294966528  ;;  %p225_p1 = scmp.lt.s32.totalorder %s946_s15, 1  ;;  %v959_v0 = vmov 0.0   ;;  %vm960_vm0 = vmmov 0   ;;  %vm246_vm1 = vcmask 1043456  }
  0x1e   : > { %827 = vmatprep.subr.mxu0 %v959_v0  ;;  %829 = vmatprep.mubr.msk.f32.mxu0 %vm960_vm0, %v959_v0  ;;  %vm242_vm2 = vcmask 31744   ;;  %v241_v2 = vld [vmem:[%s1074_s1] sm:$0x3f]  ;;  %v321_v3 = vld [vmem:[#allocation2 + $0x8] sm:$0xff]  ;;  %v806_v5 = vld [vmem:[%s1074_s1 + $0x10] sm:$0x3f] }
  0x1f   : > { %s1085_s15 = smov (!%p225_p1, %s946_s15), 1  ;;  %832 = vmatprep.subr.mxu1 %v959_v0  ;;  %836 = vmatprep.mubr.msk.f32.mxu1 %vm960_vm0, %v959_v0  ;;  %v802_v4 = vld [vmem:[%s1074_s1 + $0x8] sm:$0x3f]  ;;  %v320_v6 = vld [vmem:[#allocation2] sm:$0xff]  ;;  %vm322_vm3 = vcmask 130048   ;;  %v474_v7 = vld [vmem:[#allocation2 + $0x18] sm:$0xff] }
  0x20   : > { %s797_s29 = sshll.u32 %s1085_s15, 2  ;;  %833 = vmatpush3.msra.mxu1 %v321_v3  ;;  %v473_v9 = vld [vmem:[#allocation2 + $0x10] sm:$0xff]  ;;  %v626_v11 = vld [vmem:[#allocation2 + $0x28] sm:$0xff]  ;;  %v625_v13 = vld [vmem:[#allocation2 + $0x20] sm:$0xff]  ;;  %s798_s18 = sshll.u32 %s1085_s15, 3  ;;  %vm701_vm4 = vcmask 390144  }
  0x21   : > { %s231_s6 = scalar_lea.vmem %s1073_s0, %s797_s29  ;;  %834 = vmatprep.subr.mxu1 %v959_v0  ;;  %v239_v18 = vld [vmem:[%s1076_s3] sm:$0x3f]  ;;  %s238_s22 = scalar_lea.vmem %s1077_s4, %s798_s18 }
  0x22   : > { %v240_v1 = vld [vmem:[%s231_s6] sm:$0xf]  ;;  %835 = vmatpush3.msra.mxu1 %v320_v6 }
  0x23   : > { %828 = vmatpush3.msk.msra.mxu0 %vm246_vm1, %v240_v1  ;;  %844 = vmatprep.subr.mxu1 %v959_v0 }
  0x24   : > { %830 = vmatmul.mubr.msk.f32.vlgmr.msra.gmra.mxu0 %vm242_vm2, %v241_v2  ;;  %839 = vmatprep.subr.mxu0 %v959_v0 }
  0x25   : > { %840 = vmatpush3.msk.msra.mxu0 %vm246_vm1, %v240_v1  ;;  %841 = vmatprep.mubr.msk.f32.mxu0 %vm960_vm0, %v959_v0 }
  0x26   : > { %851 = vmatprep.subr.mxu0 %v959_v0 }
  0x28   : > { %842 = vmatmul.mubr.msk.f32.vlgmr.msra.gmra.mxu0 %vm242_vm2, %v802_v4 }
  0x29   : > { %852 = vmatpush3.msk.msra.mxu0 %vm246_vm1, %v240_v1  ;;  %853 = vmatprep.mubr.msk.f32.mxu0 %vm960_vm0, %v959_v0 }
  0x2c   : > { %854 = vmatmul.mubr.msk.f32.vlgmr.msra.gmra.mxu0 %vm242_vm2, %v806_v5 }
  0xe4   : > { %v316_v8 = vpop.f32.mrf.mxu0 }
  0xe5   : > { %837 = vmatmul.mubr.msk.f32.vlgmr.msra.gmra.mxu1 %vm322_vm3, %v316_v8 }
  0xe6   : > { %v831_v10 = vpop.f32.mrf.mxu0  ;;  %845 = vmatpush3.msra.mxu1 %v474_v7  ;;  %848 = vmatprep.mubr.msk.f32.mxu1 %vm960_vm0, %v959_v0 }
  0xe7   : > { %846 = vmatprep.subr.mxu1 %v959_v0 }
  0xe8   : > { %v468_v12 = vpop.f32.mrf.mxu0  ;;  %847 = vmatpush3.msra.mxu1 %v473_v9 }
  0xe9   : > { %849 = vmatmul.mubr.msk.f32.vlgmr.msra.gmra.mxu1 %vm322_vm3, %v468_v12  ;;  %856 = vmatprep.subr.mxu1 %v959_v0 }
  0xea   : > { %v843_v14 = vpop.f32.mrf.mxu0  ;;  %857 = vmatpush3.msra.mxu1 %v626_v11  ;;  %860 = vmatprep.mubr.msk.f32.mxu1 %vm960_vm0, %v959_v0 }
  0xeb   : > { %858 = vmatprep.subr.mxu1 %v959_v0 }
  0xec   : > { %v620_v15 = vpop.f32.mrf.mxu0  ;;  %859 = vmatpush3.msra.mxu1 %v625_v13 }
  0xed   : > { %861 = vmatmul.mubr.msk.f32.vlgmr.msra.gmra.mxu1 %vm322_vm3, %v620_v15 }
  0xee   : > { %v855_v16 = vpop.f32.mrf.mxu0 }
 0x1a5   : > { %v392_v17 = vpop.f32.mrf.mxu1 }
 0x1a6   : > { %v396_v21 = vadd.f32 %v392_v17, %v239_v18 }
 0x1a7   : > { %v838_v19 = vpop.f32.mrf.mxu1 }
 0x1a9   : > { %v544_v20 = vpop.f32.mrf.mxu1 }
 0x1aa   : > { %v548_v23 = vadd.f32 %v544_v20, %v396_v21 }
 0x1ab   : > { %v850_v22 = vpop.f32.mrf.mxu1 }
 0x1ad   : > { %v696_v24 = vpop.f32.mrf.mxu1 }
 0x1ae   : > { %v700_v25 = vadd.f32 %v696_v24, %v548_v23 }
 0x1af   : > { %v862_v26 = vpop.f32.mrf.mxu1 }
 0x1b0   : > { %702 = vst.msk [vmem:[%s238_s22] sm:$0x3f] %vm701_vm4, %v700_v25 }
 0x1b1 PF: > { %s15_s17 = sadd.s32 1, %s954_s17   ;;  %s1080_s15 = smov %s950_s16 }
 0x1b2   : > { %p12_p2 = scmp.ge.s32.totalorder %s15_s17, 4   ;;  %s1081_s16 = smov %s1083_s19 }
 0x1b4   :  { %14 = sbr.rel (!%p12_p2) target bundleno = 2 (0x2), region = 75 }
 0x1b9   :  { %728 = vsyncpa [#allocation3], 1 }
 0x1ba   :  { %730 = vsyncpa [#allocation3 + $0x1], 1 }

</bundles_post_ra>
